<compile_context>
chip_gen: v7x
topology: tpu7x:2x2x1
jax: 0.10.0
libtpu: 0.0.40
codegen_flags: <defaults>
</compile_context>

<pallas_src>
import math
import jax
import jax.numpy as jnp
from jax import lax
from jax.experimental import pallas as pl
from jax.experimental.pallas import tpu as pltpu


def _round_up(a, b):
    return (a + b - 1) // b * b


def _head_matmul_kernel(w_ref, x_ref, o_ref):
    # o = W @ X_tile^T : (N, TILE_M).  Contraction on the last dim of BOTH
    # operands -> no HBM-side weight transpose; output last dim is the large
    # token-tile dim (lane-dense stores).
    o_ref[...] = lax.dot_general(
        w_ref[...],
        x_ref[...],
        dimension_numbers=(((1,), (1,)), ((), ())),
        preferred_element_type=jnp.float32,
    ).astype(o_ref.dtype)


def pallas_head_matmul(x2d, weight, *, tile_m=512, out_dtype=None):
    """x2d: (M, K), weight: (N, K)  ->  y^T: (N, M) in `out_dtype`."""
    M, K = x2d.shape
    N, K2 = weight.shape
    assert K == K2
    out_dtype = jnp.dtype(out_dtype or x2d.dtype)

    # Tile selection: big pipelined tiles for large M, minimal padding for small M.
    if M <= tile_m:
        tile_m = max(8, _round_up(M, 8))
    m_pad = _round_up(M, tile_m)
    if m_pad != M:
        x2d = jnp.pad(x2d, ((0, m_pad - M), (0, 0)))
    num_tiles = m_pad // tile_m

    in_itemsize = jnp.dtype(x2d.dtype).itemsize
    cost = pl.CostEstimate(
        flops=2 * m_pad * K * N,
        transcendentals=0,
        bytes_accessed=(m_pad * K + N * K) * in_itemsize
        + m_pad * N * out_dtype.itemsize,
    )

    y_t = pl.pallas_call(
        _head_matmul_kernel,
        out_shape=jax.ShapeDtypeStruct((N, m_pad), out_dtype),
        grid_spec=pltpu.PrefetchScalarGridSpec(
            num_scalar_prefetch=0,
            grid=(num_tiles,),
            in_specs=[
                pl.BlockSpec((N, K), lambda i: (0, 0)),       # weight: VMEM-resident
                pl.BlockSpec((tile_m, K), lambda i: (i, 0)),  # tokens: streamed/pipelined
            ],
            out_specs=pl.BlockSpec((N, tile_m), lambda i: (0, i)),  # lane-dense Y^T
        ),
        compiler_params=pltpu.CompilerParams(
            dimension_semantics=("parallel",),  # independent M tiles -> v7x megacore
        ),
        cost_estimate=cost,
    )(weight, x2d)
    return y_t[:, :M]


def prediction_head_forward(x, weight, out_channels, patch_size, num_patches,
                            *, compute_dtype=None, tile_m=512):
    """
    x      : (B, H, W, Cin)        tokens on a (num_patches) grid
    weight : (Cout*p1*p2, Cin)     PyTorch nn.Linear weight layout (no bias)
    returns: (B, Cout, H*p1, W*p2) channels-first, matching the PyTorch module.

    compute_dtype: optionally cast x/weight (e.g. jnp.bfloat16) to halve HBM
    traffic for this bandwidth-bound matmul; accumulation stays f32 and the
    result is produced in x.dtype.
    """
    B, H, W, Cin = x.shape
    p1, p2 = patch_size
    h, w = num_patches
    assert (H, W) == (h, w)
    C = out_channels
    N = C * p1 * p2
    assert weight.shape == (N, Cin)

    out_dtype = x.dtype
    x2d = x.reshape(B * H * W, Cin)
    w2d = weight
    if compute_dtype is not None:
        x2d = x2d.astype(compute_dtype)
        w2d = w2d.astype(compute_dtype)

    # ---- hot path: tiled, pipelined matmul producing lane-dense Y^T ----
    y_t = pallas_head_matmul(x2d, w2d, tile_m=tile_m, out_dtype=out_dtype)  # (N, B*H*W)

    # ---- glue: 'b h w (c p1 p2) -> b c (h p1) (w p2)' on the transposed result ----
    y = y_t.reshape(C, p1, p2, B, H, W)
    y = jnp.transpose(y, (3, 0, 4, 1, 5, 2))  # (B, C, H, p1, W, p2)
    return y.reshape(B, C, H * p1, W * p2)


if __name__ == "__main__":
    # Small shapes implied by the module (ndim = 2, image-like case).
    batch = 2
    in_channels = 32
    out_channels = 4
    patch_size = (2, 2)
    num_patches = (4, 4)
    N = out_channels * math.prod(patch_size)

    key = jax.random.PRNGKey(0)
    kx, kw = jax.random.split(key)
    # Input tokens: (b, h, w, in_channels)
    x = jax.random.normal(
        kx, (batch, num_patches[0], num_patches[1], in_channels), dtype=jnp.float32
    )
    # Deterministic nn.Linear-style weight init (kaiming-uniform-ish bound).
    bound = 1.0 / math.sqrt(in_channels)
    weight = jax.random.uniform(
        kw, (N, in_channels), minval=-bound, maxval=bound, dtype=jnp.float32
    )

    out = prediction_head_forward(x, weight, out_channels, patch_size, num_patches)
    out = jax.block_until_ready(out)

    # Pure-JAX reference (same semantics as the PyTorch forward).
    y_ref = jnp.einsum(
        "bhwk,nk->bhwn", x, weight, precision=jax.lax.Precision.HIGHEST
    )
    y_ref = y_ref.reshape(
        batch, num_patches[0], num_patches[1],
        out_channels, patch_size[0], patch_size[1],
    )
    y_ref = jnp.transpose(y_ref, (0, 3, 1, 4, 2, 5)).reshape(
        batch,
        out_channels,
        num_patches[0] * patch_size[0],
        num_patches[1] * patch_size[1],
    )

    assert out.shape == y_ref.shape
    max_err = float(jnp.max(jnp.abs(out - y_ref)))
    assert jnp.allclose(out, y_ref, atol=1e-4, rtol=1e-4), max_err

    print("KERNEL_OK")
</pallas_src>

<mosaic_0001>
module attributes {stable_mosaic.version = 11 : i64} {
  func.func @_head_matmul_kernel(%arg0: i32, %arg1: memref<16x32xf32, #tpu.memory_space<vmem>>, %arg2: memref<32x32xf32, #tpu.memory_space<vmem>>, %arg3: memref<16x32xf32, #tpu.memory_space<vmem>>) attributes {dimension_semantics = [#tpu.dimension_semantics<parallel>], iteration_bounds = array<i64: 1>, scalar_prefetch = 0 : i64, scratch_operands = 0 : i64, tpu.core_type = #tpu.core_type<tc>, window_params = [{pipeline_mode = #tpu.pipeline_mode<synchronous>, transform_indices = @transform_0, window_bounds = array<i64: 16, 32>}, {transform_indices = @transform_1, window_bounds = array<i64: 32, 32>}, {transform_indices = @transform_2, window_bounds = array<i64: 16, 32>}]} {
    %c0 = arith.constant 0 : index
    %c0_0 = arith.constant 0 : index
    %0 = vector.load %arg1[%c0, %c0_0] : memref<16x32xf32, #tpu.memory_space<vmem>>, vector<16x32xf32>
    %c0_1 = arith.constant 0 : index
    %c0_2 = arith.constant 0 : index
    %1 = vector.load %arg2[%c0_1, %c0_2] : memref<32x32xf32, #tpu.memory_space<vmem>>, vector<32x32xf32>
    %cst = arith.constant dense<0.000000e+00> : vector<16x32xf32>
    %2 = tpu.matmul %0, %1, %cst {dimension_numbers = #tpu.dot_dimension_numbers<[1], [1], [0], [0], [0, 0, 1, 0], [], []>} : vector<16x32xf32>, vector<32x32xf32>, vector<16x32xf32> -> vector<16x32xf32>
    %c0_3 = arith.constant 0 : index
    %c0_4 = arith.constant 0 : index
    %3 = vector.load %arg3[%c0_3, %c0_4] : memref<16x32xf32, #tpu.memory_space<vmem>>, vector<16x32xf32>
    tpu.vector_store %arg3[%c0_3, %c0_4], %2 {strides = array<i32>} : memref<16x32xf32, #tpu.memory_space<vmem>>, vector<16x32xf32>,
    return
  }
  func.func @transform_0(%arg0: i32) -> (i32, i32) {
    %c0_i32 = arith.constant 0 : i32
    %c0_i32_0 = arith.constant 0 : i32
    %c0_i32_1 = arith.constant 0 : i32
    return %c0_i32, %c0_i32_0 : i32, i32
  }
  func.func @transform_1(%arg0: i32) -> (i32, i32) {
    %c0_i32 = arith.constant 0 : i32
    %c0_i32_0 = arith.constant 0 : i32
    return %arg0, %c0_i32 : i32, i32
  }
  func.func @transform_2(%arg0: i32) -> (i32, i32) {
    %c0_i32 = arith.constant 0 : i32
    %c0_i32_0 = arith.constant 0 : i32
    return %c0_i32, %arg0 : i32, i32
  }
}

</mosaic_0001>

<bundles_post_ra>
// kernel: tpu_custom_call.1
= control target key start
LH: loop header
LB: loop body
LE: loop exit
PB: predicated region body
PF: predicated region fallthrough
CT: control target
= control target key end

     0   :  { %7 = vsyncpa [#allocation3], 0  ;;  %s343_s0 = inlined_call_operand.hbm [shape: f32[16,32], index: 0, kind: input, shape index: {}]   ;;  %s344_s1 = inlined_call_operand.hbm [shape: f32[32,32], index: 1, kind: input, shape index: {}]   ;;  %s345_s2 = inlined_call_operand.hbm [shape: f32[16,32], index: 2, kind: output, shape index: {}]  }
   0x1   :  { %8 = vsyncpa [#allocation6], 0 }
   0x2   :  { %9 = vsyncpa [#allocation4], 0  ;;  %s272_s9 = smov [#allocation2]   ;;  %s200_s13 = scalar_lea.hbm %s343_s0, 256 }
   0x3   :  { %s15_s10 = sshll.u32 %s272_s9, 4  ;;  %p201_p0 = scmp.ne.s32.totalorder %s343_s0, %s200_s13  ;;  %s16_s10 = int_to_ptr.vmem [resolvable:$true] %s15_s10 }
   0x4   :  { %p204_p1 = scmp.lt.u32.totalorder %s200_s13, %s343_s0 }
   0x6   :  { %p206_p2 = pnand %p204_p1, %p201_p0 }
   0x8   :  { %209 = shalt.err (!%p206_p2)
}
   0x9   :  { %s210_s18 = scalar_lea.vmem %s16_s10, 256  ;;  %p215_p4 = scmp.lt.s32.totalorder %s16_s10, %s16_s10 }
   0xa   :  { %p211_p3 = scmp.ne.s32.totalorder %s16_s10, %s210_s18  ;;  %p216_p5 = scmp.lt.s32.totalorder %s210_s18, %s210_s18 }
   0xc   :  { %p217_p6 = por %p216_p5, %p215_p4 }
   0xe   :  { %p218_p7 = pnand %p217_p6, %p211_p3 }
  0x10   :  { %221 = shalt.err (!%p218_p7)
}
  0x11   :  { %s273_s19 = smov 128   ;;  %s274_s20 = smov 8  }
  0x12   :  { %21 = dma.hbm_to_vmem [thread:$0]  %s343_s0, 256, %s16_s10, [#allocation3], %s273_s19, %s273_s19, %s274_s20  }
  0x13   :  { %s275_s23 = smov [#allocation5]   ;;  %s222_s27 = scalar_lea.hbm %s344_s1, 512 }
  0x14   :  { %s27_s24 = sshll.u32 %s275_s23, 4  ;;  %p223_p8 = scmp.ne.s32.totalorder %s344_s1, %s222_s27  ;;  %s28_s24 = int_to_ptr.vmem [resolvable:$true] %s27_s24 }
  0x15   :  { %p226_p9 = scmp.lt.u32.totalorder %s222_s27, %s344_s1 }
  0x17   :  { %p228_p10 = pnand %p226_p9, %p223_p8 }
  0x19   :  { %231 = shalt.err (!%p228_p10)
}
  0x1a   :  { %s232_s4 = scalar_lea.vmem %s28_s24, 512  ;;  %p237_p12 = scmp.lt.s32.totalorder %s28_s24, %s28_s24 }
  0x1b   :  { %p233_p11 = scmp.ne.s32.totalorder %s28_s24, %s232_s4  ;;  %p238_p13 = scmp.lt.s32.totalorder %s232_s4, %s232_s4 }
  0x1d   :  { %p239_p0 = por %p238_p13, %p237_p12 }
  0x1f   :  { %p240_p1 = pnand %p239_p0, %p233_p11 }
  0x21   :  { %243 = shalt.err (!%p240_p1)
}
  0x22   :  { %33 = dma.hbm_to_vmem [thread:$0]  %s344_s1, 512, %s28_s24, [#allocation6], %s273_s19, %s273_s19, %s274_s20  }
  0x23   :  { %266 = dma.done.wait [#allocation3], 256  }
  0x24   :  { %267 = vsyncadd [#allocation3], 4294967040 }
  0x25   :  { %268 = dma.done.wait [#allocation6], 512  }
  0x26   :  { %269 = vsyncadd [#allocation6], 4294966784  ;;  %vm46_vm0 = vcmask 261120   ;;  %v42_v0 = vld [vmem:[#allocation5] sm:$0xff]  ;;  %v43_v1 = vld [vmem:[#allocation5 + $0x8] sm:$0xff]  ;;  %s276_s1 = smov [#allocation7]  }
  0x27   :  { %vm184_vm1 = vmpackc.low %vm46_vm0, %vm46_vm0  ;;  %v44_v2 = vld [vmem:[#allocation5 + $0x10] sm:$0xff]  ;;  %v183_v3 = vpack.c.bf16 %v43_v1, %v42_v0  ;;  %v45_v4 = vld [vmem:[#allocation5 + $0x18] sm:$0xff]  ;;  %s147_s6 = sshll.u32 %s276_s1, 4  ;;  %s148_s6 = int_to_ptr.vmem [resolvable:$true] %s147_s6 }
  0x28   :  { %v40_v5 = vld [vmem:[#allocation2] sm:$0xff]  ;;  %v189_v6 = vpack.c.bf16 %v45_v4, %v44_v2  ;;  %v41_v7 = vld [vmem:[#allocation2 + $0x8] sm:$0xff]  ;;  %s244_s7 = scalar_lea.vmem %s148_s6, 256  ;;  %p249_p3 = scmp.lt.s32.totalorder %s148_s6, %s148_s6 }
  0x29   :  { %180 = vmatprep.mubr.msk.f32.mxu0 %vm46_vm0, %v40_v5  ;;  %185 = vmatprep.subr.msk.bf16.mxu0 %vm184_vm1, %v183_v3  ;;  %p245_p2 = scmp.ne.s32.totalorder %s148_s6, %s244_s7  ;;  %p250_p4 = scmp.lt.s32.totalorder %s244_s7, %s244_s7 }
  0x2a   :  { %188 = vmatpush3.bf16.xpose.msk.msra.mxu0 %vm184_vm1, %v183_v3 }
  0x2b   :  { %191 = vmatprep.subr.msk.bf16.mxu0 %vm184_vm1, %v189_v6  ;;  %p251_p5 = por %p250_p4, %p249_p3 }
  0x2d   :  { %p252_p6 = pnand %p251_p5, %p245_p2 }
  0x32   :  { %194 = vmatpush3.bf16.xpose.msk.msra.mxu0 %vm184_vm1, %v189_v6 }
  0x39   :  { %181 = vmatmul.mubr.msk.f32.vlgmr.msra.gmra.mrb[0].mxu0 %vm46_vm0, %v41_v7 }
 0x10c   :  { %v182_v8 = vpop.f32.mrb[0].mxu0 }
 0x10d   :  { %141 = vst.msk [vmem:[#allocation7 + $0x8] sm:$0xff] %vm46_vm0, %v182_v8  ;;  %v131_v9 = vpop.f32.mrb[1].mxu0 }
 0x10e   :  { %140 = vst.msk [vmem:[#allocation7] sm:$0xff] %vm46_vm0, %v131_v9 }
 0x10f   :  { %255 = shalt.err (!%p252_p6)
}
 0x110   :  { %s256_s10 = scalar_lea.hbm %s345_s2, 256 }
 0x111   :  { %p257_p7 = scmp.ne.s32.totalorder %s345_s2, %s256_s10  ;;  %p260_p8 = scmp.lt.u32.totalorder %s256_s10, %s345_s2 }
 0x113   :  { %p262_p9 = pnand %p260_p8, %p257_p7 }
 0x115   :  { %265 = shalt.err (!%p262_p9)
}
 0x116   :  { %153 = dma.vmem_to_hbm [thread:$0]  %s148_s6, 256, %s345_s2, [#allocation4], %s273_s19, %s273_s19, %s274_s20  }
 0x117   :  { %270 = dma.done.wait [#allocation4], 256  }
 0x118   :  { %271 = vsyncadd [#allocation4], 4294967040 }
 0x119   :  { %157 = vsyncpa [#allocation3], 1 }
 0x11a   :  { %158 = vsyncpa [#allocation6], 1 }
 0x11b   :  { %159 = vsyncpa [#allocation4], 1 }

</bundles_post_ra>
